<compile_context>
chip_gen: v7x
topology: tpu7x:2x2x1
jax: 0.10.0
libtpu: 0.0.40
codegen_flags: <defaults>
</compile_context>

<pallas_src>
import functools

import jax
import jax.numpy as jnp
from jax.experimental import pallas as pl
from jax.experimental.pallas import tpu as pltpu

_MIB = 1 << 20


def _round_up(x, m):
    return (x + m - 1) // m * m


def _largest_dividing_tile(np_, max_th):
    """Largest multiple of 128 that divides np_ and is <= max_th (>=128)."""
    max_th = max(128, min(np_, (max_th // 128) * 128))
    for th in range(max_th, 127, -128):
        if np_ % th == 0:
            return th
    return 128


@functools.lru_cache(maxsize=1)
def _vmem_capacity_bytes():
    """Per-core VMEM capacity; conservative 64 MiB fallback keeps v7x safe."""
    try:
        return int(pltpu.get_tpu_info().vmem_capacity_bytes)
    except Exception:
        return 64 * _MIB


@functools.lru_cache(maxsize=1)
def _buffered_supported():
    """Feature-detect BlockSpec(pipeline_mode=pl.Buffered(1)) exactly once."""
    if not hasattr(pl, "Buffered"):
        return False
    try:
        def k(x_ref, o_ref):
            o_ref[...] = x_ref[...]

        fn = pl.pallas_call(
            k,
            out_shape=jax.ShapeDtypeStruct((8, 128), jnp.float32),
            grid=(1,),
            in_specs=[pl.BlockSpec((8, 128), lambda i: (0, 0),
                                   pipeline_mode=pl.Buffered(1))],
            out_specs=pl.BlockSpec((8, 128), lambda i: (0, 0)),
        )
        jax.jit(fn).lower(jnp.zeros((8, 128), jnp.float32)).compile()
        return True
    except Exception:
        return False


def _vmem_limit(est_bytes):
    cap = int(0.85 * _vmem_capacity_bytes())
    return int(min(max(est_bytes, 16 * _MIB), cap))


# ------------------------------ kernels -------------------------------------


def _mlp_resident_kernel(x_ref, w1_ref, b1_ref, w2_ref, b2_ref, o_ref):
    # x:(tm,Np) bf16  w1:(Np,Np)  b1:(1,Np) f32  w2:(Np,Mp)  b2:(1,Mp) f32
    w1 = w1_ref[...].astype(jnp.bfloat16)   # no-op for bf16, upcast for fp8
    w2 = w2_ref[...].astype(jnp.bfloat16)
    h = jnp.dot(x_ref[...], w1, preferred_element_type=jnp.float32)
    h = h + b1_ref[...]
    y = jnp.dot(h.astype(jnp.bfloat16), w2, preferred_element_type=jnp.float32)
    o_ref[...] = (y + b2_ref[...]).astype(o_ref.dtype)


def _mlp_splitk_kernel(x_ref, w1_ref, b1_ref, w2_ref, b2_ref, o_ref):
    # Grid = (splits, batch_tiles, hidden_tiles_per_split).
    # splits/batch tiles are "parallel" (v7x dual-TC); the hidden axis is the
    # reduction ("arbitrary").  The f32 partial output block is constant over
    # the hidden axis, so it stays VMEM-resident and we accumulate into it
    # directly (no separate scratch).
    # x:(tm,Np) bf16  w1:(Np,th)  b1:(1,th) f32  w2:(th,Mp)  b2:(1,Mp) f32
    c = pl.program_id(0)
    k = pl.program_id(2)

    @pl.when(k == 0)
    def _():
        o_ref[...] = jnp.zeros_like(o_ref)

    w1 = w1_ref[...].astype(jnp.bfloat16)
    w2 = w2_ref[...].astype(jnp.bfloat16)
    h = jnp.dot(x_ref[...], w1, preferred_element_type=jnp.float32)
    h = h + b1_ref[...]
    o_ref[...] += jnp.dot(h.astype(jnp.bfloat16), w2,
                          preferred_element_type=jnp.float32)

    @pl.when(k == pl.num_programs(2) - 1)
    def _():
        # b2 is added exactly once (split 0); other splits are pure partials.
        o_ref[...] += jnp.where(c == 0, 1.0, 0.0) * b2_ref[...]


# ------------------------------ wrappers -------------------------------------


def prepare_params(w1, b1, w2, b2, *, weight_dtype=jnp.bfloat16):
    """One-time conversion from torch nn.Linear layout (out,in) to kernel layout.

    Transposes to (in,out), casts weights to `weight_dtype` (bf16 default; pass
    jnp.float8_e4m3fn on v7x to halve HBM weight traffic — the kernel upcasts
    to bf16 for the MXU, accumulation stays f32), pads features to multiples
    of 128.  Call once at init; repeated forwards reuse the result.
    """
    w1 = jnp.asarray(w1); b1 = jnp.asarray(b1)
    w2 = jnp.asarray(w2); b2 = jnp.asarray(b2)
    N = w1.shape[1]
    M = w2.shape[0]
    assert w1.shape == (N, N) and w2.shape == (M, N)
    assert b1.shape == (N,) and b2.shape == (M,)
    Np, Mp = _round_up(N, 128), _round_up(M, 128)
    w1t = jnp.zeros((Np, Np), weight_dtype).at[:N, :N].set(w1.T.astype(weight_dtype))
    w2t = jnp.zeros((Np, Mp), weight_dtype).at[:N, :M].set(w2.T.astype(weight_dtype))
    b1p = jnp.zeros((1, Np), jnp.float32).at[0, :N].set(b1.astype(jnp.float32))
    b2p = jnp.zeros((1, Mp), jnp.float32).at[0, :M].set(b2.astype(jnp.float32))
    return {"w1t": w1t, "b1": b1p, "w2t": w2t, "b2": b2p, "n": N, "m": M}


def _resident_call(xp, p, tm, out_dtype):
    Bp, Np = xp.shape
    Mp = p["w2t"].shape[1]
    w_itemsize = p["w1t"].dtype.itemsize
    w_bytes = (Np * Np + Np * Mp) * w_itemsize
    out_itemsize = jnp.dtype(out_dtype).itemsize

    single = _buffered_supported()
    const_kw = {"pipeline_mode": pl.Buffered(1)} if single else {}
    wbuf = 1 if single else 2
    est = (2 * tm * Np * 2                       # x tiles (bf16, double-buf)
           + wbuf * w_bytes                      # resident weights
           + wbuf * (Np + Mp) * 4                # biases
           + 2 * tm * Mp * out_itemsize          # out tiles
           + 4 * _MIB)
    flops = 2 * Bp * (Np * Np + Np * Mp)
    bytes_accessed = (Bp * Np * 2 + w_bytes + (Np + Mp) * 4
                      + Bp * Mp * out_itemsize)

    return pl.pallas_call(
        _mlp_resident_kernel,
        out_shape=jax.ShapeDtypeStruct((Bp, Mp), out_dtype),
        grid_spec=pltpu.PrefetchScalarGridSpec(
            num_scalar_prefetch=0,
            grid=(Bp // tm,),
            in_specs=[
                pl.BlockSpec((tm, Np), lambda i: (i, 0)),          # x tile
                pl.BlockSpec((Np, Np), lambda i: (0, 0), **const_kw),  # W1^T
                pl.BlockSpec((1, Np), lambda i: (0, 0), **const_kw),   # b1
                pl.BlockSpec((Np, Mp), lambda i: (0, 0), **const_kw),  # W2^T
                pl.BlockSpec((1, Mp), lambda i: (0, 0), **const_kw),   # b2
            ],
            out_specs=pl.BlockSpec((tm, Mp), lambda i: (i, 0)),
        ),
        compiler_params=pltpu.CompilerParams(
            dimension_semantics=("parallel",),
            vmem_limit_bytes=_vmem_limit(est),
        ),
        cost_estimate=pl.CostEstimate(flops=flops, transcendentals=0,
                                      bytes_accessed=bytes_accessed),
    )(xp, p["w1t"], p["b1"], p["w2t"], p["b2"])


def _splitk_call(xp, p, tm, th, num_splits):
    Bp, Np = xp.shape
    Mp = p["w2t"].shape[1]
    w_itemsize = p["w1t"].dtype.itemsize
    k_total = Np // th
    ks = k_total // num_splits                   # hidden tiles per split

    const_kw = {"pipeline_mode": pl.Buffered(1)} if _buffered_supported() else {}

    est = (2 * tm * Np * 2                       # x tiles (bf16, double-buf)
           + 2 * (Np * th + th * Mp) * w_itemsize  # weight tiles (double-buf)
           + 2 * th * 4 + 2 * Mp * 4             # bias tiles
           + 2 * tm * Mp * 4                     # f32 partial-out double-buffer
           + 4 * _MIB)
    w_bytes = (Np * Np + Np * Mp) * w_itemsize
    flops = 2 * Bp * (Np * Np + Np * Mp)
    bytes_accessed = ((Bp // tm) * w_bytes       # weights streamed per batch tile
                      + num_splits * Bp * Np * 2
                      + num_splits * Bp * Mp * 4)

    return pl.pallas_call(
        _mlp_splitk_kernel,
        out_shape=jax.ShapeDtypeStruct((num_splits, Bp, Mp), jnp.float32),
        grid_spec=pltpu.PrefetchScalarGridSpec(
            num_scalar_prefetch=0,
            grid=(num_splits, Bp // tm, ks),
            in_specs=[
                pl.BlockSpec((tm, Np), lambda c, i, k: (i, 0)),           # x
                pl.BlockSpec((Np, th), lambda c, i, k: (0, c * ks + k)),  # W1^T col tile
                pl.BlockSpec((1, th), lambda c, i, k: (0, c * ks + k)),   # b1 tile
                pl.BlockSpec((th, Mp), lambda c, i, k: (c * ks + k, 0)),  # W2^T row tile
                pl.BlockSpec((1, Mp), lambda c, i, k: (0, 0), **const_kw),  # b2
            ],
            out_specs=pl.BlockSpec((None, tm, Mp), lambda c, i, k: (c, i, 0)),
        ),
        compiler_params=pltpu.CompilerParams(
            dimension_semantics=("parallel", "parallel", "arbitrary"),
            vmem_limit_bytes=_vmem_limit(est),
        ),
        cost_estimate=pl.CostEstimate(flops=flops, transcendentals=0,
                                      bytes_accessed=bytes_accessed),
    )(xp, p["w1t"], p["b1"], p["w2t"], p["b2"])


def basic_mlp(x, params, *, tm=None, hidden_tile=None, num_splits=None):
    """Fused BasicMLP forward.  x: (B, N); params from prepare_params."""
    B, N = x.shape
    assert N == params["n"], "feature dim mismatch"
    M = params["m"]
    Np = params["w1t"].shape[0]
    Mp = params["w2t"].shape[1]
    w_itemsize = params["w1t"].dtype.itemsize
    weight_bytes = (Np * Np + Np * Mp) * w_itemsize

    capacity = _vmem_capacity_bytes()

    # Batch tile: large enough that the (HBM-bound) weight stream is not
    # repeated needlessly per batch tile; bigger cap on 128 MiB VMEM parts.
    tm_cap = 512 if capacity >= 96 * _MIB else 256
    if tm is None:
        tm = min(_round_up(B, 16), tm_cap)
    tm = max(16, _round_up(tm, 16))
    Bp = _round_up(B, tm)

    xp = x.astype(jnp.bfloat16)
    if (Bp, Np) != (B, N):
        xp = jnp.zeros((Bp, Np), jnp.bfloat16).at[:B, :N].set(xp)

    # Resident path: weights fully VMEM-resident (single-buffered if the
    # installed jax supports pl.Buffered); output emitted directly in x.dtype.
    if hidden_tile is None and weight_bytes <= capacity // 3:
        budget = capacity // 3 if _buffered_supported() else capacity // 6
        if weight_bytes <= budget:
            y = _resident_call(xp, params, tm, x.dtype)
            return y[:B, :M]

    # Hidden-dimension-tiled path with split-K over the hidden axis: each split
    # (one per v7x TensorCore) streams a disjoint chunk of W1/W2 into a private
    # f32 partial output; partials are summed by one cheap XLA add below.
    tiled_budget = capacity // 4                 # double-buffered weight tiles
    if hidden_tile is None:
        max_th = max(128, tiled_budget // (2 * w_itemsize * (Np + Mp)))
    else:
        max_th = hidden_tile
    th = _largest_dividing_tile(Np, max_th)
    k_total = Np // th

    if num_splits is None:
        num_splits = 2 if (k_total >= 2 and k_total % 2 == 0) else 1
    if k_total % num_splits != 0:
        num_splits = 1

    partials = _splitk_call(xp, params, tm, th, num_splits)
    y = partials[0] if num_splits == 1 else jnp.sum(partials, axis=0)
    return y[:B, :M].astype(x.dtype)


def init_linear_params(key, in_features, out_features, dtype=jnp.float32):
    """Mimic torch.nn.Linear default init: U(-1/sqrt(in), 1/sqrt(in))."""
    kw, kb = jax.random.split(key)
    bound = 1.0 / (in_features ** 0.5)
    w = jax.random.uniform(kw, (out_features, in_features), dtype,
                           minval=-bound, maxval=bound)
    b = jax.random.uniform(kb, (out_features,), dtype,
                           minval=-bound, maxval=bound)
    return w, b


if __name__ == "__main__":
    key = jax.random.PRNGKey(0)

    # Case 1: small version of the torch spec (x = torch.ones(32, 4096)) —
    # exercises the resident-weights path (Buffered(1) when supported).
    B, N, M = 32, 256, 128
    k1, k2, key = jax.random.split(key, 3)
    w1, b1 = init_linear_params(k1, N, N)      # self.ff    = nn.Linear(n, n)
    w2, b2 = init_linear_params(k2, N, M)      # self.layer = nn.Linear(n, m)
    x = jnp.ones((B, N), dtype=jnp.float32)

    params = prepare_params(w1, b1, w2, b2)    # one-time transpose/cast/pad
    y = jax.block_until_ready(basic_mlp(x, params))
    y_ref = (x @ w1.T + b1) @ w2.T + b2
    assert y.shape == (B, M)
    # bf16 MXU operands with f32 accumulation -> looser tolerance than pure f32.
    assert jnp.allclose(y, y_ref, atol=5e-2, rtol=5e-2), "resident path mismatch"

    # Case 2: hidden-dim-tiled + split-K path (2 partial outputs), ragged batch
    # (B=40) and unaligned output features (M=192 -> padded to 256, sliced back).
    B2, N2, M2 = 40, 512, 192
    k1, k2, k3, key = jax.random.split(key, 4)
    w1b, b1b = init_linear_params(k1, N2, N2)
    w2b, b2b = init_linear_params(k2, N2, M2)
    x2 = jax.random.normal(k3, (B2, N2), dtype=jnp.float32)

    params2 = prepare_params(w1b, b1b, w2b, b2b)
    y2 = jax.block_until_ready(basic_mlp(x2, params2, hidden_tile=128))
    y2_ref = (x2 @ w1b.T + b1b) @ w2b.T + b2b
    assert y2.shape == (B2, M2)
    assert jnp.allclose(y2, y2_ref, atol=5e-2, rtol=5e-2), "split-K path mismatch"

    print("KERNEL_OK")
</pallas_src>

<mosaic_0001>
module attributes {stable_mosaic.version = 11 : i64} {
  func.func @_mlp_resident_kernel(%arg0: i32, %arg1: memref<32x256xbf16, #tpu.memory_space<vmem>>, %arg2: memref<256x256xbf16, #tpu.memory_space<vmem>>, %arg3: memref<1x256xf32, #tpu.memory_space<vmem>>, %arg4: memref<256x128xbf16, #tpu.memory_space<vmem>>, %arg5: memref<1x128xf32, #tpu.memory_space<vmem>>, %arg6: memref<32x128xf32, #tpu.memory_space<vmem>>) attributes {dimension_semantics = [#tpu.dimension_semantics<parallel>], iteration_bounds = array<i64: 1>, scalar_prefetch = 0 : i64, scratch_operands = 0 : i64, tpu.core_type = #tpu.core_type<tc>, window_params = [{transform_indices = @transform_0, window_bounds = array<i64: 32, 256>}, {pipeline_mode = #tpu.pipeline_mode<synchronous>, transform_indices = @transform_1, window_bounds = array<i64: 256, 256>}, {pipeline_mode = #tpu.pipeline_mode<synchronous>, transform_indices = @transform_2, window_bounds = array<i64: 1, 256>}, {pipeline_mode = #tpu.pipeline_mode<synchronous>, transform_indices = @transform_3, window_bounds = array<i64: 256, 128>}, {pipeline_mode = #tpu.pipeline_mode<synchronous>, transform_indices = @transform_4, window_bounds = array<i64: 1, 128>}, {transform_indices = @transform_5, window_bounds = array<i64: 32, 128>}]} {
    %c0 = arith.constant 0 : index
    %c0_0 = arith.constant 0 : index
    %0 = vector.load %arg2[%c0, %c0_0] : memref<256x256xbf16, #tpu.memory_space<vmem>>, vector<256x256xbf16>
    %c0_1 = arith.constant 0 : index
    %c0_2 = arith.constant 0 : index
    %1 = vector.load %arg4[%c0_1, %c0_2] : memref<256x128xbf16, #tpu.memory_space<vmem>>, vector<256x128xbf16>
    %c0_3 = arith.constant 0 : index
    %c0_4 = arith.constant 0 : index
    %2 = vector.load %arg1[%c0_3, %c0_4] : memref<32x256xbf16, #tpu.memory_space<vmem>>, vector<32x256xbf16>
    %cst = arith.constant dense<0.000000e+00> : vector<32x256xf32>
    %3 = tpu.matmul %2, %0, %cst {dimension_numbers = #tpu.dot_dimension_numbers<[1], [0], [0], [1], [0, 0, 1, 1], [], []>} : vector<32x256xbf16>, vector<256x256xbf16>, vector<32x256xf32> -> vector<32x256xf32>
    %c0_5 = arith.constant 0 : index
    %c0_6 = arith.constant 0 : index
    %4 = vector.load %arg3[%c0_5, %c0_6] : memref<1x256xf32, #tpu.memory_space<vmem>>, vector<1x256xf32>
    %5 = vector.broadcast %4 : vector<1x256xf32> to vector<32x256xf32>
    %6 = arith.addf %3, %5 : vector<32x256xf32>
    %7 = arith.truncf %6 : vector<32x256xf32> to vector<32x256xbf16>
    %cst_7 = arith.constant dense<0.000000e+00> : vector<32x128xf32>
    %8 = tpu.matmul %7, %1, %cst_7 {dimension_numbers = #tpu.dot_dimension_numbers<[1], [0], [0], [1], [0, 0, 1, 1], [], []>} : vector<32x256xbf16>, vector<256x128xbf16>, vector<32x128xf32> -> vector<32x128xf32>
    %c0_8 = arith.constant 0 : index
    %c0_9 = arith.constant 0 : index
    %9 = vector.load %arg5[%c0_8, %c0_9] : memref<1x128xf32, #tpu.memory_space<vmem>>, vector<1x128xf32>
    %10 = vector.broadcast %9 : vector<1x128xf32> to vector<32x128xf32>
    %11 = arith.addf %8, %10 : vector<32x128xf32>
    %c0_10 = arith.constant 0 : index
    %c0_11 = arith.constant 0 : index
    %12 = vector.load %arg6[%c0_10, %c0_11] : memref<32x128xf32, #tpu.memory_space<vmem>>, vector<32x128xf32>
    tpu.vector_store %arg6[%c0_10, %c0_11], %11 {strides = array<i32>} : memref<32x128xf32, #tpu.memory_space<vmem>>, vector<32x128xf32>,
    return
  }
  func.func @transform_0(%arg0: i32) -> (i32, i32) {
    %c0_i32 = arith.constant 0 : i32
    %c0_i32_0 = arith.constant 0 : i32
    return %arg0, %c0_i32 : i32, i32
  }
  func.func @transform_1(%arg0: i32) -> (i32, i32) {
    %c0_i32 = arith.constant 0 : i32
    %c0_i32_0 = arith.constant 0 : i32
    %c0_i32_1 = arith.constant 0 : i32
    return %c0_i32, %c0_i32_0 : i32, i32
  }
  func.func @transform_2(%arg0: i32) -> (i32, i32) {
    %c0_i32 = arith.constant 0 : i32
    %c0_i32_0 = arith.constant 0 : i32
    %c0_i32_1 = arith.constant 0 : i32
    return %c0_i32, %c0_i32_0 : i32, i32
  }
  func.func @transform_3(%arg0: i32) -> (i32, i32) {
    %c0_i32 = arith.constant 0 : i32
    %c0_i32_0 = arith.constant 0 : i32
    %c0_i32_1 = arith.constant 0 : i32
    return %c0_i32, %c0_i32_0 : i32, i32
  }
  func.func @transform_4(%arg0: i32) -> (i32, i32) {
    %c0_i32 = arith.constant 0 : i32
    %c0_i32_0 = arith.constant 0 : i32
    %c0_i32_1 = arith.constant 0 : i32
    return %c0_i32, %c0_i32_0 : i32, i32
  }
  func.func @transform_5(%arg0: i32) -> (i32, i32) {
    %c0_i32 = arith.constant 0 : i32
    %c0_i32_0 = arith.constant 0 : i32
    return %arg0, %c0_i32 : i32, i32
  }
}

</mosaic_0001>

<bundles_post_ra>
// kernel: tpu_custom_call.1
= control target key start
LH: loop header
LB: loop body
LE: loop exit
PB: predicated region body
PF: predicated region fallthrough
CT: control target
= control target key end

     0   :  { %10 = vsyncpa [#allocation3], 0  ;;  %s915_s0 = inlined_call_operand.hbm [shape: bf16[32,256], index: 0, kind: input, shape index: {}]   ;;  %s916_s1 = inlined_call_operand.hbm [shape: bf16[256,256], index: 1, kind: input, shape index: {}]   ;;  %s917_s2 = inlined_call_operand.vmem [shape: f32[1,256], index: 2, kind: input, shape index: {}]   ;;  %s918_s3 = inlined_call_operand.hbm [shape: bf16[256,128], index: 3, kind: input, shape index: {}]   ;;  %s919_s4 = inlined_call_operand.vmem [shape: f32[1,128], index: 4, kind: input, shape index: {}]   ;;  %s920_s5 = inlined_call_operand.hbm [shape: f32[32,128], index: 5, kind: output, shape index: {}]  }
   0x1   :  { %11 = vsyncpa [#allocation6], 0 }
   0x2   :  { %12 = vsyncpa [#allocation4], 0  ;;  %s807_s18 = smov [#allocation5]   ;;  %s808_s20 = smov [#allocation2]  }
   0x3   :  { %s30_s19 = sshll.u32 %s807_s18, 4  ;;  %s18_s21 = sshll.u32 %s808_s20, 4  ;;  %s31_s19 = int_to_ptr.vmem [resolvable:$true] %s30_s19  ;;  %s845_s21 = int_to_ptr.vmem [resolvable:$true] %s18_s21 }
   0x4   :  { %s713_s24 = scalar_lea.hbm %s916_s1, 4096 }
   0x5   :  { %p714_p0 = scmp.ne.s32.totalorder %s916_s1, %s713_s24  ;;  %p717_p1 = scmp.lt.u32.totalorder %s713_s24, %s916_s1 }
   0x7   :  { %p719_p2 = pnand %p717_p1, %p714_p0 }
   0x9   :  { %722 = shalt.err (!%p719_p2)
}
   0xa   :  { %s723_s29 = scalar_lea.vmem %s31_s19, 4096  ;;  %p728_p4 = scmp.lt.s32.totalorder %s31_s19, %s31_s19 }
   0xb   :  { %p724_p3 = scmp.ne.s32.totalorder %s31_s19, %s723_s29  ;;  %p729_p5 = scmp.lt.s32.totalorder %s723_s29, %s723_s29 }
   0xd   :  { %p730_p6 = por %p729_p5, %p728_p4 }
   0xf   :  { %p731_p7 = pnand %p730_p6, %p724_p3 }
  0x11   :  { %734 = shalt.err (!%p731_p7)
}
  0x12   :  { %s809_s30 = smov 128   ;;  %s810_s6 = smov 8  }
  0x13   :  { %36 = dma.hbm_to_vmem [thread:$0]  %s916_s1, 4096, %s31_s19, [#allocation6], %s809_s30, %s809_s30, %s810_s6  }
  0x14   :  { %s735_s11 = scalar_lea.hbm %s915_s0, 512 }
  0x15   :  { %p736_p8 = scmp.ne.s32.totalorder %s915_s0, %s735_s11  ;;  %p739_p9 = scmp.lt.u32.totalorder %s735_s11, %s915_s0 }
  0x17   :  { %p741_p10 = pnand %p739_p9, %p736_p8 }
  0x19   :  { %744 = shalt.err (!%p741_p10)
}
  0x1a   :  { %s745_s16 = scalar_lea.vmem %s845_s21, 512  ;;  %p750_p12 = scmp.lt.s32.totalorder %s845_s21, %s845_s21 }
  0x1b   :  { %p746_p11 = scmp.ne.s32.totalorder %s845_s21, %s745_s16  ;;  %p751_p13 = scmp.lt.s32.totalorder %s745_s16, %s745_s16 }
  0x1d   :  { %p752_p0 = por %p751_p13, %p750_p12 }
  0x1f   :  { %p753_p1 = pnand %p752_p0, %p746_p11 }
  0x21   :  { %756 = shalt.err (!%p753_p1)
}
  0x22   :  { %24 = dma.hbm_to_vmem [thread:$0]  %s915_s0, 512, %s845_s21, [#allocation3], %s809_s30, %s809_s30, %s810_s6  }
  0x23   :  { %s811_s18 = smov [#allocation7]   ;;  %s757_s23 = scalar_lea.hbm %s918_s3, 2048 }
  0x24   :  { %s44_s19 = sshll.u32 %s811_s18, 4  ;;  %p758_p2 = scmp.ne.s32.totalorder %s918_s3, %s757_s23  ;;  %s45_s19 = int_to_ptr.vmem [resolvable:$true] %s44_s19 }
  0x25   :  { %p761_p3 = scmp.lt.u32.totalorder %s757_s23, %s918_s3 }
  0x27   :  { %p763_p4 = pnand %p761_p3, %p758_p2 }
  0x29   :  { %766 = shalt.err (!%p763_p4)
}
  0x2a   :  { %s767_s28 = scalar_lea.vmem %s45_s19, 2048  ;;  %p772_p6 = scmp.lt.s32.totalorder %s45_s19, %s45_s19 }
  0x2b   :  { %p768_p5 = scmp.ne.s32.totalorder %s45_s19, %s767_s28  ;;  %p773_p7 = scmp.lt.s32.totalorder %s767_s28, %s767_s28 }
  0x2d   :  { %p774_p8 = por %p773_p7, %p772_p6 }
  0x2f   :  { %p775_p9 = pnand %p774_p8, %p768_p5 }
  0x31   :  { %778 = shalt.err (!%p775_p9)
}
  0x32   :  { %s812_s0 = smov 64   ;;  %s813_s21 = smov 4  }
  0x33   :  { %50 = dma.hbm_to_vmem [thread:$0]  %s918_s3, 2048, %s45_s19, [#allocation6], %s812_s0, %s812_s0, %s813_s21  }
  0x34   :  { %801 = dma.done.wait [#allocation3], 512  }
  0x35   :  { %802 = vsyncadd [#allocation3], 4294966784 }
  0x36   :  { %803 = dma.done.wait [#allocation6], 6144  }
  0x37   :  { %804 = vsyncadd [#allocation6], 4294961152  ;;  %v643_v0 = vld [vmem:[#allocation5 + $0x4] ss:$8 sps:$4 sm:$0xff]   ;;  %v645_v1 = vld [vmem:[#allocation5] ss:$8 sps:$4 sm:$0xff]   ;;  %v133_v52 = vlaneseq }
  0x38   :  { %323 = vmatprep.subr.bf16.mxu0 %v643_v0  ;;  %v646_v2 = vld [vmem:[#allocation5 + $0x14] ss:$8 sps:$4 sm:$0xff]   ;;  %v648_v3 = vld [vmem:[#allocation5 + $0x10] ss:$8 sps:$4 sm:$0xff]   ;;  %v649_v4 = vld [vmem:[#allocation5 + $0x24] ss:$8 sps:$4 sm:$0xff]  }
  0x39   :  { %324 = vmatpush1.bf16.msra.mxu0 %v645_v1  ;;  %v651_v5 = vld [vmem:[#allocation5 + $0x20] ss:$8 sps:$4 sm:$0xff]   ;;  %v652_v6 = vld [vmem:[#allocation5 + $0x34] ss:$8 sps:$4 sm:$0xff]   ;;  %v654_v7 = vld [vmem:[#allocation5 + $0x30] ss:$8 sps:$4 sm:$0xff]  }
  0x3a   :  { %325 = vmatprep.subr.bf16.mxu0 %v646_v2  ;;  %v655_v8 = vld [vmem:[#allocation5 + $0x44] ss:$8 sps:$4 sm:$0xff]   ;;  %v657_v9 = vld [vmem:[#allocation5 + $0x40] ss:$8 sps:$4 sm:$0xff]   ;;  %v658_v10 = vld [vmem:[#allocation5 + $0x54] ss:$8 sps:$4 sm:$0xff]  }
  0x3b   :  { %v660_v11 = vld [vmem:[#allocation5 + $0x50] ss:$8 sps:$4 sm:$0xff]   ;;  %v661_v12 = vld [vmem:[#allocation5 + $0x64] ss:$8 sps:$4 sm:$0xff]   ;;  %v663_v14 = vld [vmem:[#allocation5 + $0x60] ss:$8 sps:$4 sm:$0xff]  }
  0x3c   :  { %v693_v13 = vld [vmem:[#allocation2 + $0x4] ss:$8 sps:$4 sm:$0xff]   ;;  %v664_v15 = vld [vmem:[#allocation5 + $0x74] ss:$8 sps:$4 sm:$0xff]   ;;  %v666_v17 = vld [vmem:[#allocation5 + $0x70] ss:$8 sps:$4 sm:$0xff]  }
  0x3d   :  { %326 = vmatpush1.bf16.msra.mxu0 %v648_v3  ;;  %355 = vmatprep.mubr.bf16.mxu0 %v693_v13  ;;  %v697_v16 = vld [vmem:[#allocation7 + $0x40] sm:$0xff]   ;;  %v699_v20 = vld [vmem:[#allocation7 + $0x48] sm:$0xff]   ;;  %v701_v22 = vld [vmem:[#allocation7 + $0x50] sm:$0xff]   ;;  %v134_v53 = vshrl.u32 %v133_v52, 7  ;;  %s814_s10 = smov [#allocation8]  }
  0x3e   :  { %327 = vmatprep.subr.bf16.mxu0 %v649_v4  ;;  %v698_v18 = vld [vmem:[#allocation7] sm:$0xff]   ;;  %607 = vmatprep.subr.bf16.mxu1 %v697_v16  ;;  %v700_v21 = vld [vmem:[#allocation7 + $0x8] sm:$0xff]   ;;  %v670_v24 = vld [vmem:[#allocation5 + $0x94] ss:$8 sps:$4 sm:$0xff]   ;;  %s541_s11 = sshll.u32 %s814_s10, 4  ;;  %s542_s11 = int_to_ptr.vmem [resolvable:$true] %s541_s11 }
  0x3f   :  { %v667_v19 = vld [vmem:[#allocation5 + $0x84] ss:$8 sps:$4 sm:$0xff]   ;;  %608 = vmatpush3.bf16.msra.mxu1 %v698_v18  ;;  %v669_v23 = vld [vmem:[#allocation5 + $0x80] ss:$8 sps:$4 sm:$0xff]   ;;  %v702_v25 = vld [vmem:[#allocation7 + $0x10] sm:$0xff]   ;;  %v135_v54 = vsub.s32 0, %v134_v53  ;;  %p784_p11 = scmp.lt.s32.totalorder %s542_s11, %s542_s11 }
  0x40   :  { %609 = vmatprep.subr.bf16.mxu1 %v699_v20  ;;  %v703_v26 = vld [vmem:[#allocation7 + $0x58] sm:$0xff]   ;;  %v673_v28 = vld [vmem:[#allocation5 + $0xa4] ss:$8 sps:$4 sm:$0xff]   ;;  %v675_v31 = vld [vmem:[#allocation5 + $0xa0] ss:$8 sps:$4 sm:$0xff]   ;;  %v139_v56 = vsub.s32 1, %v134_v53 }
  0x41   :  { %328 = vmatpush1.bf16.msra.mxu0 %v651_v5  ;;  %v672_v27 = vld [vmem:[#allocation5 + $0x90] ss:$8 sps:$4 sm:$0xff]   ;;  %v705_v30 = vld [vmem:[#allocation7 + $0x60] sm:$0xff]   ;;  %v676_v33 = vld [vmem:[#allocation5 + $0xb4] ss:$8 sps:$4 sm:$0xff]  }
  0x42   :  { %329 = vmatprep.subr.bf16.mxu0 %v652_v6  ;;  %v704_v29 = vld [vmem:[#allocation7 + $0x18] sm:$0xff]   ;;  %v706_v32 = vld [vmem:[#allocation7 + $0x20] sm:$0xff]   ;;  %v707_v34 = vld [vmem:[#allocation7 + $0x68] sm:$0xff]  }
  0x43   :  { %610 = vmatpush3.bf16.msra.mxu1 %v700_v21  ;;  %v678_v35 = vld [vmem:[#allocation5 + $0xb0] ss:$8 sps:$4 sm:$0xff]   ;;  %v708_v36 = vld [vmem:[#allocation7 + $0x28] sm:$0xff]   ;;  %v682_v39 = vld [vmem:[#allocation5 + $0xd4] ss:$8 sps:$4 sm:$0xff]  }
  0x44   :  { %611 = vmatprep.subr.bf16.mxu1 %v701_v22  ;;  %v679_v37 = vld [vmem:[#allocation5 + $0xc4] ss:$8 sps:$4 sm:$0xff]   ;;  %v681_v38 = vld [vmem:[#allocation5 + $0xc0] ss:$8 sps:$4 sm:$0xff]   ;;  %v684_v40 = vld [vmem:[#allocation5 + $0xd0] ss:$8 sps:$4 sm:$0xff]  }
  0x45   :  { %330 = vmatpush1.bf16.msra.mxu0 %v654_v7  ;;  %v685_v41 = vld [vmem:[#allocation5 + $0xe4] ss:$8 sps:$4 sm:$0xff]   ;;  %v687_v42 = vld [vmem:[#allocation5 + $0xe0] ss:$8 sps:$4 sm:$0xff]   ;;  %v688_v43 = vld [vmem:[#allocation5 + $0xf4] ss:$8 sps:$4 sm:$0xff]  }
  0x46   :  { %331 = vmatprep.subr.bf16.mxu0 %v655_v8  ;;  %v690_v44 = vld [vmem:[#allocation5 + $0xf0] ss:$8 sps:$4 sm:$0xff]   ;;  %v691_v45 = vld [vmem:[#allocation2] ss:$8 sps:$4 sm:$0xff]   ;;  %v694_v46 = vld [vmem:[#allocation2 + $0x14] ss:$8 sps:$4 sm:$0xff]  }
  0x47   :  { %612 = vmatpush3.bf16.msra.mxu1 %v702_v25  ;;  %v696_v47 = vld [vmem:[#allocation2 + $0x10] ss:$8 sps:$4 sm:$0xff]   ;;  %v131_v55 = vld [vmem:[%s917_s2] sm:$0x3] }
  0x48   :  { %613 = vmatprep.subr.bf16.mxu1 %v703_v26  ;;  %v709_v48 = vld [vmem:[#allocation7 + $0x70] sm:$0xff]   ;;  %v711_v50 = vld [vmem:[#allocation7 + $0x78] sm:$0xff]   ;;  %v136_v57 = vrot.slane %v131_v55, %v135_v54  ;;  %v140_v59 = vrot.slane %v131_v55, %v139_v56  ;;  %v590_v16 = vld [vmem:[%s919_s4] ss:$0 sm:$0xff]  ;;  %s779_s4 = scalar_lea.vmem %s542_s11, 512 }
  0x49   :  { %332 = vmatpush1.bf16.msra.mxu0 %v657_v9  ;;  %v710_v49 = vld [vmem:[#allocation7 + $0x30] sm:$0xff]   ;;  %v712_v51 = vld [vmem:[#allocation7 + $0x38] sm:$0xff]   ;;  %p780_p10 = scmp.ne.s32.totalorder %s542_s11, %s779_s4  ;;  %p785_p12 = scmp.lt.s32.totalorder %s779_s4, %s779_s4 }
  0x4a   :  { %333 = vmatprep.subr.bf16.mxu0 %v658_v10 }
  0x4b   :  { %614 = vmatpush3.bf16.msra.mxu1 %v704_v29  ;;  %p786_p13 = por %p785_p12, %p784_p11 }
  0x4c   :  { %615 = vmatprep.subr.bf16.mxu1 %v705_v30 }
  0x4d   :  { %334 = vmatpush1.bf16.msra.mxu0 %v660_v11  ;;  %p787_p0 = pnand %p786_p13, %p780_p10 }
  0x4e   :  { %335 = vmatprep.subr.bf16.mxu0 %v661_v12 }
  0x4f   :  { %616 = vmatpush3.bf16.msra.mxu1 %v706_v32 }
  0x50   :  { %617 = vmatprep.subr.bf16.mxu1 %v707_v34 }
  0x51   :  { %336 = vmatpush1.bf16.msra.mxu0 %v663_v14 }
  0x52   :  { %337 = vmatprep.subr.bf16.mxu0 %v664_v15 }
  0x53   :  { %618 = vmatpush3.bf16.msra.mxu1 %v708_v36 }
  0x54   :  { %619 = vmatprep.subr.bf16.mxu1 %v709_v48 }
  0x55   :  { %338 = vmatpush1.bf16.msra.mxu0 %v666_v17 }
  0x56   :  { %339 = vmatprep.subr.bf16.mxu0 %v667_v19 }
  0x57   :  { %620 = vmatpush3.bf16.msra.mxu1 %v710_v49 }
  0x58   :  { %621 = vmatprep.subr.bf16.mxu1 %v711_v50 }
  0x59   :  { %340 = vmatpush1.bf16.msra.mxu0 %v669_v23 }
  0x5a   :  { %341 = vmatprep.subr.bf16.mxu0 %v670_v24 }
  0x5b   :  { %622 = vmatpush3.bf16.msra.mxu1 %v712_v51 }
  0x5d   :  { %342 = vmatpush1.bf16.msra.mxu0 %v672_v27 }
  0x5e   :  { %343 = vmatprep.subr.bf16.mxu0 %v673_v28 }
  0x61   :  { %344 = vmatpush1.bf16.msra.mxu0 %v675_v31 }
  0x62   :  { %345 = vmatprep.subr.bf16.mxu0 %v676_v33 }
  0x65   :  { %346 = vmatpush1.bf16.msra.mxu0 %v678_v35 }
  0x66   :  { %347 = vmatprep.subr.bf16.mxu0 %v679_v37 }
  0x69   :  { %348 = vmatpush1.bf16.msra.mxu0 %v681_v38 }
  0x6a   :  { %349 = vmatprep.subr.bf16.mxu0 %v682_v39 }
  0x6d   :  { %350 = vmatpush1.bf16.msra.mxu0 %v684_v40 }
  0x6e   :  { %351 = vmatprep.subr.bf16.mxu0 %v685_v41 }
  0x71   :  { %352 = vmatpush1.bf16.msra.mxu0 %v687_v42 }
  0x72   :  { %353 = vmatprep.subr.bf16.mxu0 %v688_v43 }
  0x75   :  { %354 = vmatpush1.bf16.msra.mxu0 %v690_v44 }
  0x78   :  { %356 = vmatmul.mubr.bf16.vlgmr.msra.gmra.mrb[0].mxu0 %v691_v45 }
  0x79   :  { %365 = vmatprep.mubr.bf16.mxu0 %v694_v46 }
  0x80   :  { %366 = vmatmul.mubr.bf16.gmra.mrb[4].mxu0 %v696_v47 }
 0x14b   :  { %v357_v58 = vpop.f32.mrb[0].mxu0 }
 0x14c   :  { %v359_v60 = vpop.f32.mrb[1].mxu0  ;;  %v358_v62 = vadd.f32 %v357_v58, %v136_v57 }
 0x14d   :  { %v361_v61 = vpop.f32.mrb[2].mxu0  ;;  %v360_v1 = vadd.f32 %v359_v60, %v140_v59 }
 0x14e   :  { %v362_v63 = vadd.f32 %v361_v61, %v136_v57  ;;  %v363_v0 = vpop.f32.mrb[3].mxu0 }
 0x14f   :  { %v364_v2 = vadd.f32 %v363_v0, %v140_v59 }
 0x150   :  { %v376_v3 = vpack.c.bf16 %v362_v63, %v358_v62 }
 0x151   :  { %v377_v4 = vpack.c.bf16 %v364_v2, %v360_v1 }
 0x153   :  { %v367_v5 = vpop.f32.mrb[4].mxu0  ;;  %515 = vmatprep.mubr.bf16.mxu1 %v377_v4 }
 0x154   :  { %v369_v6 = vpop.f32.mrb[5].mxu0  ;;  %516 = vmatmul.mubr.bf16.vlgmr.msra.gmra.mrb[0].mxu1 %v376_v3  ;;  %v368_v8 = vadd.f32 %v367_v5, %v136_v57 }
 0x155   :  { %v371_v7 = vpop.f32.mrb[6].mxu0  ;;  %v370_v11 = vadd.f32 %v369_v6, %v140_v59 }
 0x156   :  { %v372_v9 = vadd.f32 %v371_v7, %v136_v57  ;;  %v373_v10 = vpop.f32.mrb[7].mxu0 }
 0x157   :  { %v374_v12 = vadd.f32 %v373_v10, %v140_v59 }
 0x158   :  { %v378_v13 = vpack.c.bf16 %v372_v9, %v368_v8 }
 0x159   :  { %v379_v14 = vpack.c.bf16 %v374_v12, %v370_v11 }
 0x15b   :  { %523 = vmatprep.mubr.bf16.mxu1 %v379_v14 }
 0x15c   :  { %524 = vmatmul.mubr.bf16.gmra.mrb[4].mxu1 %v378_v13 }
 0x227   :  { %v623_v15 = vpop.f32.mrb[0].mxu1 }
 0x228   :  { %v624_v17 = vpop.f32.mrb[1].mxu1 }
 0x229   :  { %v625_v18 = vadd.f32 %v624_v17, %v623_v15  ;;  %v626_v19 = vpop.f32.mrb[2].mxu1 }
 0x22a   :  { %v627_v20 = vpop.f32.mrb[3].mxu1 }
 0x22b   :  { %v518_v21 = vadd.f32 %v625_v18, %v590_v16  ;;  %v628_v22 = vadd.f32 %v627_v20, %v626_v19 }
 0x22d   :  { %532 = vst [vmem:[#allocation8] sm:$0xff] %v518_v21  ;;  %v521_v23 = vadd.f32 %v628_v22, %v590_v16 }
 0x22f   :  { %533 = vst [vmem:[#allocation8 + $0x8] sm:$0xff] %v521_v23  ;;  %v629_v24 = vpop.f32.mrb[4].mxu1 }
 0x230   :  { %v630_v25 = vpop.f32.mrb[5].mxu1 }
 0x231   :  { %v631_v26 = vadd.f32 %v630_v25, %v629_v24  ;;  %v632_v27 = vpop.f32.mrb[6].mxu1 }
 0x232   :  { %v633_v28 = vpop.f32.mrb[7].mxu1 }
 0x233   :  { %v526_v29 = vadd.f32 %v631_v26, %v590_v16  ;;  %v634_v30 = vadd.f32 %v633_v28, %v632_v27 }
 0x235   :  { %534 = vst [vmem:[#allocation8 + $0x10] sm:$0xff] %v526_v29  ;;  %v529_v31 = vadd.f32 %v634_v30, %v590_v16 }
 0x237   :  { %535 = vst [vmem:[#allocation8 + $0x18] sm:$0xff] %v529_v31 }
 0x238   :  { %790 = shalt.err (!%p787_p0)
}
 0x239   :  { %s791_s14 = scalar_lea.hbm %s920_s5, 512 }
 0x23a   :  { %p792_p1 = scmp.ne.s32.totalorder %s920_s5, %s791_s14  ;;  %p795_p2 = scmp.lt.u32.totalorder %s791_s14, %s920_s5 }
 0x23c   :  { %p797_p3 = pnand %p795_p2, %p792_p1 }
 0x23e   :  { %800 = shalt.err (!%p797_p3)
}
 0x23f   :  { %547 = dma.vmem_to_hbm [thread:$0]  %s542_s11, 512, %s920_s5, [#allocation4], %s809_s30, %s809_s30, %s810_s6  }
 0x240   :  { %805 = dma.done.wait [#allocation4], 512  }
 0x241   :  { %806 = vsyncadd [#allocation4], 4294966784 }
 0x242   :  { %551 = vsyncpa [#allocation3], 1 }
 0x243   :  { %552 = vsyncpa [#allocation6], 1 }
 0x244   :  { %553 = vsyncpa [#allocation4], 1 }

</bundles_post_ra>
